<compile_context>
chip_gen: v5e
topology: v5e:2x2
jax: 0.10.0
libtpu: 0.0.40
codegen_flags: <defaults>
</compile_context>

<pallas_src>
import functools

import jax
import jax.numpy as jnp
from jax.experimental import pallas as pl
from jax.experimental.pallas import tpu as pltpu


# ----------------------------------------------------------------------------
# Fused kernel: one grid step == B images stacked on the sublane axis,
# data layout (B*C, H*W).
# ----------------------------------------------------------------------------
def _atten1_fused_kernel(x_ref, y_ref, z_ref, watt_ref, bias_ref, ex_ref,
                         wk_ref, shift_ref, mask_ref, o_ref, *, h, w):
    hw = h * w
    f32 = jnp.float32

    x = x_ref[...].astype(f32)          # (B*C, H*W), B images stacked on sublanes
    y = y_ref[...].astype(f32)
    z = z_ref[...].astype(f32)

    # ---- Stage 1: attention (1x1 conv over concat([x,y,z])) on the MXU -------
    # watt_ref[s] = kron(I_B, att_w[:, s*C:(s+1)*C]) is block-diagonal, so each
    # image's 3 logits only see its own channels.
    logits = (jnp.dot(watt_ref[0], x, preferred_element_type=f32)
              + jnp.dot(watt_ref[1], y, preferred_element_type=f32)
              + jnp.dot(watt_ref[2], z, preferred_element_type=f32)
              + bias_ref[...])                                   # (B*3, H*W)
    # nn.Sigmoid then nn.ReLU: relu(sigmoid(t)) == sigmoid(t) since sigmoid > 0.
    att = jax.nn.sigmoid(logits)
    # ex_ref[s] = kron(I_B, one-hot column s) replicates each image's s-th
    # attention row across that image's C channel rows.
    fused = (x * jnp.dot(ex_ref[0], att, preferred_element_type=f32)
             + y * jnp.dot(ex_ref[1], att, preferred_element_type=f32)
             + z * jnp.dot(ex_ref[2], att, preferred_element_type=f32))  # (B*C, H*W)

    # ---- Stage 2: 3x3 conv (stride 1, pad 1, no bias) + folded BN + ReLU -----
    # Tap (dh, dw) is a lane-roll of `fused` by dh*W + dw.  Rolls wrap within a
    # sublane row (i.e. within a single image); wrapped / out-of-image positions
    # are killed by the row/column boundary masks, so zero padding is implicit.
    mtop, mbot = mask_ref[0:1, :], mask_ref[1:2, :]     # valid for dh = -1 / +1
    mleft, mright = mask_ref[2:3, :], mask_ref[3:4, :]  # valid for dw = -1 / +1
    wk = wk_ref[...]                                    # (3, 3, B*C, B*C), BN-scaled
    acc = None
    for kh in range(3):
        dh = kh - 1
        if dh == 0:
            rowtap = fused
        else:
            rowtap = pltpu.roll(fused, (-dh * w) % hw, 1)   # tap[q] = fused[q + dh*W]
            rowtap = rowtap * (mtop if dh == -1 else mbot)
        for kw in range(3):
            dw = kw - 1
            if dw == 0:
                tap = rowtap
            else:
                tap = pltpu.roll(rowtap, (-dw) % hw, 1)     # tap[q] = rowtap[q + dw]
                tap = tap * (mleft if dw == -1 else mright)
            part = jnp.dot(wk[kh, kw], tap, preferred_element_type=f32)
            acc = part if acc is None else acc + part       # register accumulation
    out = acc + shift_ref[...]                              # folded BatchNorm shift
    o_ref[...] = jnp.maximum(out, 0.0).astype(o_ref.dtype)  # ReLU


# ----------------------------------------------------------------------------
# Parameter construction (deterministic, matches the nn.Module shapes)
# ----------------------------------------------------------------------------
def init_params(channel, key):
    k1, k2, k3, k4, k5, k6 = jax.random.split(key, 6)
    c = channel
    att_w = jax.random.normal(k1, (3, 3 * c), jnp.float32) * 0.2     # Conv2d(3c, 3, 1)
    att_b = jax.random.normal(k2, (3,), jnp.float32) * 0.1
    conv_w = jax.random.normal(k3, (c, c, 3, 3), jnp.float32) * 0.2  # Conv2d(c, c, 3)
    bn_gamma = 1.0 + 0.1 * jax.random.normal(k4, (c,), jnp.float32)
    bn_beta = 0.1 * jax.random.normal(k5, (c,), jnp.float32)
    bn_mean = 0.1 * jax.random.normal(k6, (c,), jnp.float32)
    bn_var = jnp.ones((c,), jnp.float32)
    return dict(att_w=att_w, att_b=att_b, conv_w=conv_w,
                bn_gamma=bn_gamma, bn_beta=bn_beta,
                bn_mean=bn_mean, bn_var=bn_var)


def _images_per_block(n, c, hw):
    """How many images to stack along the sublane axis of one grid step."""
    best = 1
    for cand in range(2, n + 1):
        if n % cand:
            continue
        if cand * c > 32:                      # keep the block-diagonal weights small
            break
        if cand * c * hw * 4 > (1 << 20):      # <= 1 MiB per input block (VMEM-safe)
            break
        if cand * c > 8 and n // cand < 8:     # keep pipelined grid steps once sublanes full
            break
        best = cand
    return best


# ----------------------------------------------------------------------------
# Wrapper: NCHW in / NCHW out, free reshape only, single pallas_call, no scratch
# ----------------------------------------------------------------------------
@jax.jit
def atten1_forward(params, x, y, z):
    n, c, h, w = x.shape
    hw = h * w
    eps = 1e-5
    b = _images_per_block(n, c, hw)
    bc, b3 = b * c, b * 3

    # Free contiguous view: (N, C, H, W) -> (N*C, H*W); lane axis is H*W.
    x2 = x.reshape(n * c, hw)
    y2 = y.reshape(n * c, hw)
    z2 = z.reshape(n * c, hw)

    eye_b = jnp.eye(b, dtype=jnp.float32)

    # Attention 1x1-conv weights, block-diagonal per image: (3 sources, B*3, B*C).
    att_w = params["att_w"]
    watt_st = jnp.stack(
        [jnp.kron(eye_b, att_w[:, s * c:(s + 1) * c]) for s in range(3)])
    bias_st = jnp.tile(params["att_b"], b).reshape(b3, 1)

    # Expanders: copy each image's s-th attention row over its C channel rows.
    ex_st = jnp.stack(
        [jnp.kron(eye_b, jnp.zeros((c, 3), jnp.float32).at[:, s].set(1.0))
         for s in range(3)])                                       # (3, B*C, B*3)

    # 3x3 conv weights with the BN scale folded in, block-diagonal per tap.
    inv_std = 1.0 / jnp.sqrt(params["bn_var"] + eps)
    scale = params["bn_gamma"] * inv_std                           # (C,)
    shift = params["bn_beta"] - params["bn_mean"] * scale          # (C,)
    wk = jnp.transpose(params["conv_w"] * scale[:, None, None, None], (2, 3, 0, 1))
    wk_st = jnp.einsum("ab,khoi->khaobi", eye_b, wk).reshape(3, 3, bc, bc)
    shift_st = jnp.tile(shift, b).reshape(bc, 1)

    # Boundary-validity masks in flattened (H*W) coordinates.
    q = jnp.arange(hw, dtype=jnp.int32)
    rowi, coli = q // w, q % w
    masks = jnp.stack([rowi > 0, rowi < h - 1, coli > 0, coli < w - 1]
                      ).astype(jnp.float32)                        # (4, H*W)

    kernel = functools.partial(_atten1_fused_kernel, h=h, w=w)
    img_spec = pl.BlockSpec((bc, hw), lambda i: (i, 0))

    def const_spec(a):
        zeros = (0,) * a.ndim
        return pl.BlockSpec(a.shape, lambda i, _z=zeros: _z)

    out2 = pl.pallas_call(
        kernel,
        out_shape=jax.ShapeDtypeStruct((n * c, hw), x.dtype),
        grid_spec=pltpu.PrefetchScalarGridSpec(
            num_scalar_prefetch=0,
            grid=(n // b,),
            in_specs=[
                img_spec, img_spec, img_spec,                      # x, y, z
                const_spec(watt_st), const_spec(bias_st),          # attention params
                const_spec(ex_st),                                 # row expanders
                const_spec(wk_st), const_spec(shift_st),           # conv + BN params
                const_spec(masks),                                 # boundary masks
            ],
            out_specs=img_spec,
        ),
        compiler_params=pltpu.CompilerParams(
            dimension_semantics=("parallel",),
        ),
    )(x2, y2, z2, watt_st, bias_st, ex_st, wk_st, shift_st, masks)

    return out2.reshape(n, c, h, w)


# ----------------------------------------------------------------------------
# Pure-JAX reference (for a sanity check in __main__)
# ----------------------------------------------------------------------------
def atten1_reference(params, x, y, z, eps=1e-5):
    cat = jnp.concatenate([x, y, z], axis=1)                       # (n, 3c, h, w)
    logits = jnp.einsum("kc,nchw->nkhw", params["att_w"], cat,
                        precision=jax.lax.Precision.HIGHEST)
    logits = logits + params["att_b"][None, :, None, None]
    att = jnp.maximum(jax.nn.sigmoid(logits), 0.0)
    fused = x * att[:, 0:1] + y * att[:, 1:2] + z * att[:, 2:3]
    conv = jax.lax.conv_general_dilated(
        fused, params["conv_w"], window_strides=(1, 1),
        padding=((1, 1), (1, 1)),
        dimension_numbers=("NCHW", "OIHW", "NCHW"),
        precision=jax.lax.Precision.HIGHEST)
    scale = params["bn_gamma"] / jnp.sqrt(params["bn_var"] + eps)
    shift = params["bn_beta"] - params["bn_mean"] * scale
    out = conv * scale[None, :, None, None] + shift[None, :, None, None]
    return jnp.maximum(out, 0.0)


if __name__ == "__main__":
    N, C, H, W = 2, 4, 16, 16
    key = jax.random.PRNGKey(0)
    kx, ky, kz = jax.random.split(key, 3)
    x = jax.random.normal(kx, (N, C, H, W), jnp.float32)
    y = jax.random.normal(ky, (N, C, H, W), jnp.float32)
    z = jax.random.normal(kz, (N, C, H, W), jnp.float32)

    params = init_params(C, jax.random.PRNGKey(42))

    out = atten1_forward(params, x, y, z)
    jax.block_until_ready(out)
    assert out.shape == (N, C, H, W), out.shape

    # Loose tolerance: the in-kernel matmuls run at the MXU's default f32
    # (multi-pass bf16) precision; structural errors would be O(0.1-1).
    ref = atten1_reference(params, x, y, z)
    err = float(jnp.max(jnp.abs(out - ref)))
    assert err < 5e-2, f"max abs error vs reference: {err}"

    print("KERNEL_OK")
</pallas_src>

<mosaic_0001>
module attributes {stable_mosaic.version = 11 : i64} {
  func.func @_atten1_fused_kernel(%arg0: i32, %arg1: memref<8x256xf32, #tpu.memory_space<vmem>>, %arg2: memref<8x256xf32, #tpu.memory_space<vmem>>, %arg3: memref<8x256xf32, #tpu.memory_space<vmem>>, %arg4: memref<3x6x8xf32, #tpu.memory_space<vmem>>, %arg5: memref<6x1xf32, #tpu.memory_space<vmem>>, %arg6: memref<3x8x6xf32, #tpu.memory_space<vmem>>, %arg7: memref<3x3x8x8xf32, #tpu.memory_space<vmem>>, %arg8: memref<8x1xf32, #tpu.memory_space<vmem>>, %arg9: memref<4x256xf32, #tpu.memory_space<vmem>>, %arg10: memref<8x256xf32, #tpu.memory_space<vmem>>) attributes {dimension_semantics = [#tpu.dimension_semantics<parallel>], iteration_bounds = array<i64: 1>, scalar_prefetch = 0 : i64, scratch_operands = 0 : i64, tpu.core_type = #tpu.core_type<tc>, window_params = [{transform_indices = @transform_0, window_bounds = array<i64: 8, 256>}, {transform_indices = @transform_1, window_bounds = array<i64: 8, 256>}, {transform_indices = @transform_2, window_bounds = array<i64: 8, 256>}, {pipeline_mode = #tpu.pipeline_mode<synchronous>, transform_indices = @transform_3, window_bounds = array<i64: 3, 6, 8>}, {pipeline_mode = #tpu.pipeline_mode<synchronous>, transform_indices = @transform_4, window_bounds = array<i64: 6, 1>}, {pipeline_mode = #tpu.pipeline_mode<synchronous>, transform_indices = @transform_5, window_bounds = array<i64: 3, 8, 6>}, {pipeline_mode = #tpu.pipeline_mode<synchronous>, transform_indices = @transform_6, window_bounds = array<i64: 3, 3, 8, 8>}, {pipeline_mode = #tpu.pipeline_mode<synchronous>, transform_indices = @transform_7, window_bounds = array<i64: 8, 1>}, {pipeline_mode = #tpu.pipeline_mode<synchronous>, transform_indices = @transform_8, window_bounds = array<i64: 4, 256>}, {transform_indices = @transform_9, window_bounds = array<i64: 8, 256>}]} {
    %c0 = arith.constant 0 : index
    %c0_0 = arith.constant 0 : index
    %0 = vector.load %arg1[%c0, %c0_0] : memref<8x256xf32, #tpu.memory_space<vmem>>, vector<8x256xf32>
    %c0_1 = arith.constant 0 : index
    %c0_2 = arith.constant 0 : index
    %1 = vector.load %arg2[%c0_1, %c0_2] : memref<8x256xf32, #tpu.memory_space<vmem>>, vector<8x256xf32>
    %c0_3 = arith.constant 0 : index
    %c0_4 = arith.constant 0 : index
    %2 = vector.load %arg3[%c0_3, %c0_4] : memref<8x256xf32, #tpu.memory_space<vmem>>, vector<8x256xf32>
    %c0_5 = arith.constant 0 : index
    %c0_6 = arith.constant 0 : index
    %c0_7 = arith.constant 0 : index
    %3 = vector.load %arg4[%c0_5, %c0_6, %c0_7] : memref<3x6x8xf32, #tpu.memory_space<vmem>>, vector<1x6x8xf32>
    %4 = vector.shape_cast %3 : vector<1x6x8xf32> to vector<6x8xf32>
    %cst = arith.constant dense<0.000000e+00> : vector<6x256xf32>
    %5 = tpu.matmul %4, %0, %cst {dimension_numbers = #tpu.dot_dimension_numbers<[1], [0], [0], [1], [0, 0, 1, 1], [], []>} : vector<6x8xf32>, vector<8x256xf32>, vector<6x256xf32> -> vector<6x256xf32>
    %c1 = arith.constant 1 : index
    %c0_8 = arith.constant 0 : index
    %c0_9 = arith.constant 0 : index
    %6 = vector.load %arg4[%c1, %c0_8, %c0_9] : memref<3x6x8xf32, #tpu.memory_space<vmem>>, vector<1x6x8xf32>
    %7 = vector.shape_cast %6 : vector<1x6x8xf32> to vector<6x8xf32>
    %cst_10 = arith.constant dense<0.000000e+00> : vector<6x256xf32>
    %8 = tpu.matmul %7, %1, %cst_10 {dimension_numbers = #tpu.dot_dimension_numbers<[1], [0], [0], [1], [0, 0, 1, 1], [], []>} : vector<6x8xf32>, vector<8x256xf32>, vector<6x256xf32> -> vector<6x256xf32>
    %9 = arith.addf %5, %8 : vector<6x256xf32>
    %c2 = arith.constant 2 : index
    %c0_11 = arith.constant 0 : index
    %c0_12 = arith.constant 0 : index
    %10 = vector.load %arg4[%c2, %c0_11, %c0_12] : memref<3x6x8xf32, #tpu.memory_space<vmem>>, vector<1x6x8xf32>
    %11 = vector.shape_cast %10 : vector<1x6x8xf32> to vector<6x8xf32>
    %cst_13 = arith.constant dense<0.000000e+00> : vector<6x256xf32>
    %12 = tpu.matmul %11, %2, %cst_13 {dimension_numbers = #tpu.dot_dimension_numbers<[1], [0], [0], [1], [0, 0, 1, 1], [], []>} : vector<6x8xf32>, vector<8x256xf32>, vector<6x256xf32> -> vector<6x256xf32>
    %13 = arith.addf %9, %12 : vector<6x256xf32>
    %c0_14 = arith.constant 0 : index
    %c0_15 = arith.constant 0 : index
    %14 = vector.load %arg5[%c0_14, %c0_15] : memref<6x1xf32, #tpu.memory_space<vmem>>, vector<6x1xf32>
    %15 = vector.broadcast %14 : vector<6x1xf32> to vector<6x256xf32>
    %16 = arith.addf %13, %15 : vector<6x256xf32>
    %17 = arith.negf %16 : vector<6x256xf32>
    %18 = math.exp %17 : vector<6x256xf32>
    %cst_16 = arith.constant 1.000000e+00 : f32
    %19 = vector.broadcast %cst_16 : f32 to vector<6x256xf32>
    %20 = arith.addf %19, %18 : vector<6x256xf32>
    %21 = arith.divf %19, %20 : vector<6x256xf32>
    %c0_17 = arith.constant 0 : index
    %c0_18 = arith.constant 0 : index
    %c0_19 = arith.constant 0 : index
    %22 = vector.load %arg6[%c0_17, %c0_18, %c0_19] : memref<3x8x6xf32, #tpu.memory_space<vmem>>, vector<1x8x6xf32>
    %23 = vector.shape_cast %22 : vector<1x8x6xf32> to vector<8x6xf32>
    %cst_20 = arith.constant dense<0.000000e+00> : vector<8x256xf32>
    %24 = tpu.matmul %23, %21, %cst_20 {dimension_numbers = #tpu.dot_dimension_numbers<[1], [0], [0], [1], [0, 0, 1, 1], [], []>} : vector<8x6xf32>, vector<6x256xf32>, vector<8x256xf32> -> vector<8x256xf32>
    %25 = arith.mulf %0, %24 : vector<8x256xf32>
    %c1_21 = arith.constant 1 : index
    %c0_22 = arith.constant 0 : index
    %c0_23 = arith.constant 0 : index
    %26 = vector.load %arg6[%c1_21, %c0_22, %c0_23] : memref<3x8x6xf32, #tpu.memory_space<vmem>>, vector<1x8x6xf32>
    %27 = vector.shape_cast %26 : vector<1x8x6xf32> to vector<8x6xf32>
    %cst_24 = arith.constant dense<0.000000e+00> : vector<8x256xf32>
    %28 = tpu.matmul %27, %21, %cst_24 {dimension_numbers = #tpu.dot_dimension_numbers<[1], [0], [0], [1], [0, 0, 1, 1], [], []>} : vector<8x6xf32>, vector<6x256xf32>, vector<8x256xf32> -> vector<8x256xf32>
    %29 = arith.mulf %1, %28 : vector<8x256xf32>
    %30 = arith.addf %25, %29 : vector<8x256xf32>
    %c2_25 = arith.constant 2 : index
    %c0_26 = arith.constant 0 : index
    %c0_27 = arith.constant 0 : index
    %31 = vector.load %arg6[%c2_25, %c0_26, %c0_27] : memref<3x8x6xf32, #tpu.memory_space<vmem>>, vector<1x8x6xf32>
    %32 = vector.shape_cast %31 : vector<1x8x6xf32> to vector<8x6xf32>
    %cst_28 = arith.constant dense<0.000000e+00> : vector<8x256xf32>
    %33 = tpu.matmul %32, %21, %cst_28 {dimension_numbers = #tpu.dot_dimension_numbers<[1], [0], [0], [1], [0, 0, 1, 1], [], []>} : vector<8x6xf32>, vector<6x256xf32>, vector<8x256xf32> -> vector<8x256xf32>
    %34 = arith.mulf %2, %33 : vector<8x256xf32>
    %35 = arith.addf %30, %34 : vector<8x256xf32>
    %c0_29 = arith.constant 0 : index
    %c0_30 = arith.constant 0 : index
    %36 = vector.load %arg9[%c0_29, %c0_30] : memref<4x256xf32, #tpu.memory_space<vmem>>, vector<1x256xf32>
    %c1_31 = arith.constant 1 : index
    %c0_32 = arith.constant 0 : index
    %37 = vector.load %arg9[%c1_31, %c0_32] : memref<4x256xf32, #tpu.memory_space<vmem>>, vector<1x256xf32>
    %c2_33 = arith.constant 2 : index
    %c0_34 = arith.constant 0 : index
    %38 = vector.load %arg9[%c2_33, %c0_34] : memref<4x256xf32, #tpu.memory_space<vmem>>, vector<1x256xf32>
    %c3 = arith.constant 3 : index
    %c0_35 = arith.constant 0 : index
    %39 = vector.load %arg9[%c3, %c0_35] : memref<4x256xf32, #tpu.memory_space<vmem>>, vector<1x256xf32>
    %c0_36 = arith.constant 0 : index
    %c0_37 = arith.constant 0 : index
    %c0_38 = arith.constant 0 : index
    %c0_39 = arith.constant 0 : index
    %40 = vector.load %arg7[%c0_36, %c0_37, %c0_38, %c0_39] : memref<3x3x8x8xf32, #tpu.memory_space<vmem>>, vector<3x3x8x8xf32>
    %c16_i32 = arith.constant 16 : i32
    %41 = tpu.dynamic_rotate %35 by %c16_i32 dim 1 : vector<8x256xf32>, i32 -> vector<8x256xf32>
    %42 = vector.broadcast %36 : vector<1x256xf32> to vector<8x256xf32>
    %43 = arith.mulf %41, %42 : vector<8x256xf32>
    %c1_i32 = arith.constant 1 : i32
    %44 = tpu.dynamic_rotate %43 by %c1_i32 dim 1 : vector<8x256xf32>, i32 -> vector<8x256xf32>
    %45 = vector.broadcast %38 : vector<1x256xf32> to vector<8x256xf32>
    %46 = arith.mulf %44, %45 : vector<8x256xf32>
    %47 = vector.extract_strided_slice %40 {offsets = [0, 0, 0, 0], sizes = [1, 1, 8, 8], strides = [1, 1, 1, 1]} : vector<3x3x8x8xf32> to vector<1x1x8x8xf32>
    %48 = vector.shape_cast %47 : vector<1x1x8x8xf32> to vector<8x8xf32>
    %cst_40 = arith.constant dense<0.000000e+00> : vector<8x256xf32>
    %49 = tpu.matmul %48, %46, %cst_40 {dimension_numbers = #tpu.dot_dimension_numbers<[1], [0], [0], [1], [0, 0, 1, 1], [], []>} : vector<8x8xf32>, vector<8x256xf32>, vector<8x256xf32> -> vector<8x256xf32>
    %50 = vector.extract_strided_slice %40 {offsets = [0, 1, 0, 0], sizes = [1, 1, 8, 8], strides = [1, 1, 1, 1]} : vector<3x3x8x8xf32> to vector<1x1x8x8xf32>
    %51 = vector.shape_cast %50 : vector<1x1x8x8xf32> to vector<8x8xf32>
    %cst_41 = arith.constant dense<0.000000e+00> : vector<8x256xf32>
    %52 = tpu.matmul %51, %43, %cst_41 {dimension_numbers = #tpu.dot_dimension_numbers<[1], [0], [0], [1], [0, 0, 1, 1], [], []>} : vector<8x8xf32>, vector<8x256xf32>, vector<8x256xf32> -> vector<8x256xf32>
    %53 = arith.addf %49, %52 : vector<8x256xf32>
    %c255_i32 = arith.constant 255 : i32
    %54 = tpu.dynamic_rotate %43 by %c255_i32 dim 1 : vector<8x256xf32>, i32 -> vector<8x256xf32>
    %55 = vector.broadcast %39 : vector<1x256xf32> to vector<8x256xf32>
    %56 = arith.mulf %54, %55 : vector<8x256xf32>
    %57 = vector.extract_strided_slice %40 {offsets = [0, 2, 0, 0], sizes = [1, 1, 8, 8], strides = [1, 1, 1, 1]} : vector<3x3x8x8xf32> to vector<1x1x8x8xf32>
    %58 = vector.shape_cast %57 : vector<1x1x8x8xf32> to vector<8x8xf32>
    %cst_42 = arith.constant dense<0.000000e+00> : vector<8x256xf32>
    %59 = tpu.matmul %58, %56, %cst_42 {dimension_numbers = #tpu.dot_dimension_numbers<[1], [0], [0], [1], [0, 0, 1, 1], [], []>} : vector<8x8xf32>, vector<8x256xf32>, vector<8x256xf32> -> vector<8x256xf32>
    %60 = arith.addf %53, %59 : vector<8x256xf32>
    %c1_i32_43 = arith.constant 1 : i32
    %61 = tpu.dynamic_rotate %35 by %c1_i32_43 dim 1 : vector<8x256xf32>, i32 -> vector<8x256xf32>
    %62 = vector.broadcast %38 : vector<1x256xf32> to vector<8x256xf32>
    %63 = arith.mulf %61, %62 : vector<8x256xf32>
    %64 = vector.extract_strided_slice %40 {offsets = [1, 0, 0, 0], sizes = [1, 1, 8, 8], strides = [1, 1, 1, 1]} : vector<3x3x8x8xf32> to vector<1x1x8x8xf32>
    %65 = vector.shape_cast %64 : vector<1x1x8x8xf32> to vector<8x8xf32>
    %cst_44 = arith.constant dense<0.000000e+00> : vector<8x256xf32>
    %66 = tpu.matmul %65, %63, %cst_44 {dimension_numbers = #tpu.dot_dimension_numbers<[1], [0], [0], [1], [0, 0, 1, 1], [], []>} : vector<8x8xf32>, vector<8x256xf32>, vector<8x256xf32> -> vector<8x256xf32>
    %67 = arith.addf %60, %66 : vector<8x256xf32>
    %68 = vector.extract_strided_slice %40 {offsets = [1, 1, 0, 0], sizes = [1, 1, 8, 8], strides = [1, 1, 1, 1]} : vector<3x3x8x8xf32> to vector<1x1x8x8xf32>
    %69 = vector.shape_cast %68 : vector<1x1x8x8xf32> to vector<8x8xf32>
    %cst_45 = arith.constant dense<0.000000e+00> : vector<8x256xf32>
    %70 = tpu.matmul %69, %35, %cst_45 {dimension_numbers = #tpu.dot_dimension_numbers<[1], [0], [0], [1], [0, 0, 1, 1], [], []>} : vector<8x8xf32>, vector<8x256xf32>, vector<8x256xf32> -> vector<8x256xf32>
    %71 = arith.addf %67, %70 : vector<8x256xf32>
    %c255_i32_46 = arith.constant 255 : i32
    %72 = tpu.dynamic_rotate %35 by %c255_i32_46 dim 1 : vector<8x256xf32>, i32 -> vector<8x256xf32>
    %73 = vector.broadcast %39 : vector<1x256xf32> to vector<8x256xf32>
    %74 = arith.mulf %72, %73 : vector<8x256xf32>
    %75 = vector.extract_strided_slice %40 {offsets = [1, 2, 0, 0], sizes = [1, 1, 8, 8], strides = [1, 1, 1, 1]} : vector<3x3x8x8xf32> to vector<1x1x8x8xf32>
    %76 = vector.shape_cast %75 : vector<1x1x8x8xf32> to vector<8x8xf32>
    %cst_47 = arith.constant dense<0.000000e+00> : vector<8x256xf32>
    %77 = tpu.matmul %76, %74, %cst_47 {dimension_numbers = #tpu.dot_dimension_numbers<[1], [0], [0], [1], [0, 0, 1, 1], [], []>} : vector<8x8xf32>, vector<8x256xf32>, vector<8x256xf32> -> vector<8x256xf32>
    %78 = arith.addf %71, %77 : vector<8x256xf32>
    %c240_i32 = arith.constant 240 : i32
    %79 = tpu.dynamic_rotate %35 by %c240_i32 dim 1 : vector<8x256xf32>, i32 -> vector<8x256xf32>
    %80 = vector.broadcast %37 : vector<1x256xf32> to vector<8x256xf32>
    %81 = arith.mulf %79, %80 : vector<8x256xf32>
    %c1_i32_48 = arith.constant 1 : i32
    %82 = tpu.dynamic_rotate %81 by %c1_i32_48 dim 1 : vector<8x256xf32>, i32 -> vector<8x256xf32>
    %83 = vector.broadcast %38 : vector<1x256xf32> to vector<8x256xf32>
    %84 = arith.mulf %82, %83 : vector<8x256xf32>
    %85 = vector.extract_strided_slice %40 {offsets = [2, 0, 0, 0], sizes = [1, 1, 8, 8], strides = [1, 1, 1, 1]} : vector<3x3x8x8xf32> to vector<1x1x8x8xf32>
    %86 = vector.shape_cast %85 : vector<1x1x8x8xf32> to vector<8x8xf32>
    %cst_49 = arith.constant dense<0.000000e+00> : vector<8x256xf32>
    %87 = tpu.matmul %86, %84, %cst_49 {dimension_numbers = #tpu.dot_dimension_numbers<[1], [0], [0], [1], [0, 0, 1, 1], [], []>} : vector<8x8xf32>, vector<8x256xf32>, vector<8x256xf32> -> vector<8x256xf32>
    %88 = arith.addf %78, %87 : vector<8x256xf32>
    %89 = vector.extract_strided_slice %40 {offsets = [2, 1, 0, 0], sizes = [1, 1, 8, 8], strides = [1, 1, 1, 1]} : vector<3x3x8x8xf32> to vector<1x1x8x8xf32>
    %90 = vector.shape_cast %89 : vector<1x1x8x8xf32> to vector<8x8xf32>
    %cst_50 = arith.constant dense<0.000000e+00> : vector<8x256xf32>
    %91 = tpu.matmul %90, %81, %cst_50 {dimension_numbers = #tpu.dot_dimension_numbers<[1], [0], [0], [1], [0, 0, 1, 1], [], []>} : vector<8x8xf32>, vector<8x256xf32>, vector<8x256xf32> -> vector<8x256xf32>
    %92 = arith.addf %88, %91 : vector<8x256xf32>
    %c255_i32_51 = arith.constant 255 : i32
    %93 = tpu.dynamic_rotate %81 by %c255_i32_51 dim 1 : vector<8x256xf32>, i32 -> vector<8x256xf32>
    %94 = vector.broadcast %39 : vector<1x256xf32> to vector<8x256xf32>
    %95 = arith.mulf %93, %94 : vector<8x256xf32>
    %96 = vector.extract_strided_slice %40 {offsets = [2, 2, 0, 0], sizes = [1, 1, 8, 8], strides = [1, 1, 1, 1]} : vector<3x3x8x8xf32> to vector<1x1x8x8xf32>
    %97 = vector.shape_cast %96 : vector<1x1x8x8xf32> to vector<8x8xf32>
    %cst_52 = arith.constant dense<0.000000e+00> : vector<8x256xf32>
    %98 = tpu.matmul %97, %95, %cst_52 {dimension_numbers = #tpu.dot_dimension_numbers<[1], [0], [0], [1], [0, 0, 1, 1], [], []>} : vector<8x8xf32>, vector<8x256xf32>, vector<8x256xf32> -> vector<8x256xf32>
    %99 = arith.addf %92, %98 : vector<8x256xf32>
    %c0_53 = arith.constant 0 : index
    %c0_54 = arith.constant 0 : index
    %100 = vector.load %arg8[%c0_53, %c0_54] : memref<8x1xf32, #tpu.memory_space<vmem>>, vector<8x1xf32>
    %101 = vector.broadcast %100 : vector<8x1xf32> to vector<8x256xf32>
    %102 = arith.addf %99, %101 : vector<8x256xf32>
    %cst_55 = arith.constant 0.000000e+00 : f32
    %103 = vector.broadcast %cst_55 : f32 to vector<8x256xf32>
    %104 = arith.maximumf %102, %103 : vector<8x256xf32>
    %c0_56 = arith.constant 0 : index
    %c0_57 = arith.constant 0 : index
    %105 = vector.load %arg10[%c0_56, %c0_57] : memref<8x256xf32, #tpu.memory_space<vmem>>, vector<8x256xf32>
    tpu.vector_store %arg10[%c0_56, %c0_57], %104 {strides = array<i32>} : memref<8x256xf32, #tpu.memory_space<vmem>>, vector<8x256xf32>,
    return
  }
  func.func @transform_0(%arg0: i32) -> (i32, i32) {
    %c0_i32 = arith.constant 0 : i32
    %c0_i32_0 = arith.constant 0 : i32
    return %arg0, %c0_i32 : i32, i32
  }
  func.func @transform_1(%arg0: i32) -> (i32, i32) {
    %c0_i32 = arith.constant 0 : i32
    %c0_i32_0 = arith.constant 0 : i32
    return %arg0, %c0_i32 : i32, i32
  }
  func.func @transform_2(%arg0: i32) -> (i32, i32) {
    %c0_i32 = arith.constant 0 : i32
    %c0_i32_0 = arith.constant 0 : i32
    return %arg0, %c0_i32 : i32, i32
  }
  func.func @transform_3(%arg0: i32) -> (i32, i32, i32) {
    %c0_i32 = arith.constant 0 : i32
    %c0_i32_0 = arith.constant 0 : i32
    %c0_i32_1 = arith.constant 0 : i32
    %c0_i32_2 = arith.constant 0 : i32
    return %c0_i32, %c0_i32_0, %c0_i32_1 : i32, i32, i32
  }
  func.func @transform_4(%arg0: i32) -> (i32, i32) {
    %c0_i32 = arith.constant 0 : i32
    %c0_i32_0 = arith.constant 0 : i32
    %c0_i32_1 = arith.constant 0 : i32
    return %c0_i32, %c0_i32_0 : i32, i32
  }
  func.func @transform_5(%arg0: i32) -> (i32, i32, i32) {
    %c0_i32 = arith.constant 0 : i32
    %c0_i32_0 = arith.constant 0 : i32
    %c0_i32_1 = arith.constant 0 : i32
    %c0_i32_2 = arith.constant 0 : i32
    return %c0_i32, %c0_i32_0, %c0_i32_1 : i32, i32, i32
  }
  func.func @transform_6(%arg0: i32) -> (i32, i32, i32, i32) {
    %c0_i32 = arith.constant 0 : i32
    %c0_i32_0 = arith.constant 0 : i32
    %c0_i32_1 = arith.constant 0 : i32
    %c0_i32_2 = arith.constant 0 : i32
    %c0_i32_3 = arith.constant 0 : i32
    return %c0_i32, %c0_i32_0, %c0_i32_1, %c0_i32_2 : i32, i32, i32, i32
  }
  func.func @transform_7(%arg0: i32) -> (i32, i32) {
    %c0_i32 = arith.constant 0 : i32
    %c0_i32_0 = arith.constant 0 : i32
    %c0_i32_1 = arith.constant 0 : i32
    return %c0_i32, %c0_i32_0 : i32, i32
  }
  func.func @transform_8(%arg0: i32) -> (i32, i32) {
    %c0_i32 = arith.constant 0 : i32
    %c0_i32_0 = arith.constant 0 : i32
    %c0_i32_1 = arith.constant 0 : i32
    return %c0_i32, %c0_i32_0 : i32, i32
  }
  func.func @transform_9(%arg0: i32) -> (i32, i32) {
    %c0_i32 = arith.constant 0 : i32
    %c0_i32_0 = arith.constant 0 : i32
    return %arg0, %c0_i32 : i32, i32
  }
}

</mosaic_0001>

<bundles_post_ra>
// kernel: tile.18
= control target key start
LH: loop header
LB: loop body
LE: loop exit
PB: predicated region body
PF: predicated region fallthrough
CT: control target
= control target key end

     0   :  { %s22_s0 = inlined_call_operand.vmem [shape: f32[4], index: 0, kind: input, shape index: {}]   ;;  %s23_s1 = inlined_call_operand.vmem [shape: f32[2,4], index: 1, kind: output, shape index: {}]  }
   0x1   :  { %v4_v0 = vld [vmem:[%s22_s0] ss:$0 sm:$0xff] }
   0x2   :  { %5 = vst [vmem:[%s23_s1] sm:$0x3] %v4_v0 }

// kernel: tile.1
= control target key start
LH: loop header
LB: loop body
LE: loop exit
PB: predicated region body
PF: predicated region fallthrough
CT: control target
= control target key end

     0   :  { %s34_s8 = smov 125   ;;  %s35_s9 = smov 126   ;;  %vm7_vm0 = vcmask 7168   ;;  %s61_s0 = inlined_call_operand.vmem [shape: f32[2,4], index: 0, kind: input, shape index: {}]   ;;  %s62_s1 = inlined_call_operand.vmem [shape: f32[8,1], index: 1, kind: output, shape index: {}]  }
   0x1   :  { %v4_v0 = vld [vmem:[%s61_s0] sm:$0x3]  ;;  %s33_s0 = smov 127  }
   0x2   :  { %5 = vst [vmem:[#allocation0] sm:$0x3] %v4_v0 }
   0x9   :  { %v9_v1 = vld [vmem:[#allocation0] sm:$0x3]  }
   0xa   :  { %v21_v2 = vld [vmem:[#allocation0] sm:$0x3]   ;;  %10 = vrot.lane.b32.xlu0 %v9_v1, %s33_s0 }
   0xb   :  { %22 = vrot.lane.b32.xlu1 %v21_v2, %s34_s8  ;;  %v15_v3 = vld [vmem:[#allocation0] sm:$0x3]  }
   0xc   :  { %v6_v4 = vld [vmem:[#allocation0] sm:$0x3]  }
   0xd   :  { %8 = vst.msk [vmem:[%s62_s1] ss:$4 sm:$0x3] %vm7_vm0, %v6_v4  }
  0x12   :  { %16 = vrot.lane.b32.xlu0 %v15_v3, %s35_s9 }
  0x7c   :  { %v11_v5 = vpop.permute.xlu0 %10  }
  0x7d   :  { %v23_v6 = vpop.permute.xlu1 %22   ;;  %27 = vst.msk [vmem:[%s62_s1 + $0x1] ss:$4 sm:$0x3] %vm7_vm0, %v11_v5  }
  0x7e   :  { %29 = vst.msk [vmem:[%s62_s1 + $0x3] ss:$4 sm:$0x3] %vm7_vm0, %v23_v6  }
  0x84   :  { %v17_v7 = vpop.permute.xlu0 %16  }
  0x85   :  { %28 = vst.msk [vmem:[%s62_s1 + $0x2] ss:$4 sm:$0x3] %vm7_vm0, %v17_v7  }

// kernel: tile.0
= control target key start
LH: loop header
LB: loop body
LE: loop exit
PB: predicated region body
PF: predicated region fallthrough
CT: control target
= control target key end

     0   :  { %s26_s8 = smov 126   ;;  %vm7_vm0 = vcmask 7168   ;;  %s49_s0 = inlined_call_operand.vmem [shape: f32[2,3], index: 0, kind: input, shape index: {}]   ;;  %s50_s1 = inlined_call_operand.vmem [shape: f32[6,1], index: 1, kind: output, shape index: {}]  }
   0x1   :  { %v4_v0 = vld [vmem:[%s49_s0] sm:$0x3]  ;;  %s25_s0 = smov 127  }
   0x2   :  { %5 = vst [vmem:[#allocation0] sm:$0x3] %v4_v0 }
   0x9   :  { %v9_v1 = vld [vmem:[#allocation0] sm:$0x3]  }
   0xa   :  { %10 = vrot.lane.b32.xlu0 %v9_v1, %s25_s0  ;;  %v15_v2 = vld [vmem:[#allocation0] sm:$0x3]  }
   0xb   :  { %v6_v3 = vld [vmem:[#allocation0] sm:$0x3]  }
   0xc   :  { %8 = vst.msk [vmem:[%s50_s1] ss:$3 sm:$0x3] %vm7_vm0, %v6_v3  }
  0x12   :  { %16 = vrot.lane.b32.xlu0 %v15_v2, %s26_s8 }
  0x7c   :  { %v11_v4 = vpop.permute.xlu0 %10  }
  0x7d   :  { %21 = vst.msk [vmem:[%s50_s1 + $0x1] ss:$3 sm:$0x3] %vm7_vm0, %v11_v4  }
  0x84   :  { %v17_v5 = vpop.permute.xlu0 %16  }
  0x85   :  { %22 = vst.msk [vmem:[%s50_s1 + $0x2] ss:$3 sm:$0x3] %vm7_vm0, %v17_v5  }

// kernel: atten1_forward.1
= control target key start
LH: loop header
LB: loop body
LE: loop exit
PB: predicated region body
PF: predicated region fallthrough
CT: control target
= control target key end

     0   :  { %vm41_vm0 = vcmask 64512   ;;  %v956_v3 = vmov 0   ;;  %vm226_vm5 = vcmask 1045504   ;;  %vm222_vm10 = vcmask 48128   ;;  %s958_s30 = smov 16   ;;  %s959_s12 = smov 127   ;;  %s1216_s1 = inlined_call_operand.vmem [shape: f32[8,256], index: 1, kind: input, shape index: {}]   ;;  %s1217_s0 = inlined_call_operand.vmem [shape: f32[8,256], index: 0, kind: input, shape index: {}]   ;;  %s1218_s3 = inlined_call_operand.vmem [shape: f32[3,6,8], index: 3, kind: input, shape index: {}]   ;;  %s1219_s2 = inlined_call_operand.vmem [shape: f32[8,256], index: 2, kind: input, shape index: {}]   ;;  %s1220_s4 = inlined_call_operand.vmem [shape: f32[6,1], index: 4, kind: input, shape index: {}]   ;;  %s1221_s5 = inlined_call_operand.vmem [shape: f32[3,8,6], index: 5, kind: input, shape index: {}]   ;;  %s1222_s8 = inlined_call_operand.vmem [shape: f32[4,256], index: 8, kind: input, shape index: {}]   ;;  %s1223_s6 = inlined_call_operand.vmem [shape: f32[3,3,8,8], index: 6, kind: input, shape index: {}]   ;;  %s1224_s7 = inlined_call_operand.vmem [shape: f32[8,1], index: 7, kind: input, shape index: {}]   ;;  %s1225_s9 = inlined_call_operand.vmem [shape: f32[8,256], index: 9, kind: output, shape index: {}]  }
   0x1   :  { %v1014_v0 = vld [vmem:[%s1216_s1] sm:$0xff]  ;;  %v1019_v1 = vld [vmem:[%s1216_s1 + $0x8] sm:$0xff]  ;;  %946 = vset.pattern.permute.xlu0 %v956_v3  ;;  %947 = vset.pattern.permute.xlu2 %v956_v3  ;;  %v901_v10 = vld [vmem:[%s1218_s3 + $0x10] sm:$0x3f]  ;;  %s960_s13 = smov 1  }
   0x2   :  { %v1024_v2 = vld [vmem:[%s1217_s0] sm:$0xff]  ;;  %60 = vmatpush.msra.mxu0 %v1014_v0  ;;  %80 = vmatpush.msra.mxu1 %v1019_v1  ;;  %v1031_v4 = vld [vmem:[%s1217_s0 + $0x8] sm:$0xff]  ;;  %v915_v52 = vld [vmem:[%s1221_s5 + $0x10] sm:$0xff] }
   0x3   :  { %v896_v5 = vld [vmem:[%s1218_s3 + $0x8] sm:$0x3f]  ;;  %v38_v6 = vld [vmem:[%s1218_s3] sm:$0x3f]  ;;  %103 = vmatpush.msra.mxu2 %v1024_v2  ;;  %123 = vmatpush.msra.mxu3 %v1031_v4 }
   0x4   :  { %v1044_v7 = vld [vmem:[%s1219_s2] sm:$0xff]  ;;  %v1049_v8 = vld [vmem:[%s1219_s2 + $0x8] sm:$0xff]  ;;  %897 = vmatmul.msk.f32.vlgmr.msra.gmra.mxu0 %vm41_vm0, %v896_v5  ;;  %898 = vmatmul.msk.f32.vlgmr.msra.gmra.mxu1 %vm41_vm0, %v896_v5 }
   0x5   :  { %v175_v9 = vld [vmem:[%s1220_s4] sm:$0x3f]  ;;  %899 = vmatmul.msk.f32.vlgmr.msra.gmra.mxu2 %vm41_vm0, %v38_v6  ;;  %900 = vmatmul.msk.f32.vlgmr.msra.gmra.mxu3 %vm41_vm0, %v38_v6  ;;  %v910_v51 = vld [vmem:[%s1221_s5 + $0x8] sm:$0xff] }
   0x6   :  { %148 = vmatpush.msrb.mxu0 %v1044_v7  ;;  %168 = vmatpush.msrb.mxu1 %v1049_v8  ;;  %v221_v49 = vld [vmem:[%s1221_s5] sm:$0xff]  ;;  %s957_s5 = smov 112  }
   0x7   :  { %178 = vperm.xlu0 %946, %v175_v9  }
   0xc   :  { %902 = vmatmul.msk.f32.vlgmr.msrb.gmra.mxu0 %vm41_vm0, %v901_v10  ;;  %903 = vmatmul.msk.f32.vlgmr.msrb.gmra.mxu1 %vm41_vm0, %v901_v10 }
  0x79   :  { %v179_v19 = vpop.permute.xlu0 %178 }
  0x81   :  { %v62_v11 = vpop.f32.mrf.mxu0  ;;  %v82_v12 = vpop.f32.mrf.mxu1 }
  0x88   :  { %v105_v13 = vpop.f32.mrf.mxu2  ;;  %v125_v14 = vpop.f32.mrf.mxu3 }
  0x89   :  { %v106_v15 = vadd.f32 %v105_v13, %v62_v11  ;;  %v126_v16 = vadd.f32 %v125_v14, %v82_v12  ;;  %v150_v17 = vpop.f32.mrf.mxu0  ;;  %v170_v18 = vpop.f32.mrf.mxu1 }
  0x8b   :  { %v173_v20 = vadd.f32 %v150_v17, %v106_v15  ;;  %v174_v21 = vadd.f32 %v170_v18, %v126_v16  ;;  %v920_v16 = vld [vmem:[%s1222_s8 + $0x1] ss:$4 sm:$0x3] }
  0x8d   :  { %v181_v22 = vadd.f32 %v179_v19, %v173_v20  ;;  %v182_v23 = vadd.f32 %v179_v19, %v174_v21  ;;  %v723_v19 = vperm.slane %v920_v16, 0 }
  0x8f   :  { %v904_v24 = vmul.f32 -1.442695, %v181_v22  ;;  %v905_v25 = vmul.f32 -1.442695, %v182_v23  ;;  %v724_v22 = vperm.slane %v920_v16, 1 }
  0x91   :  { %948 = vpow2.f32 %v904_v24 }
  0x92   :  { %950 = vpow2.f32 %v905_v25  ;;  %v381_v25 = vld [vmem:[%s1223_s6 + $0x8] sm:$0xff] }
  0x97   :  { %v949_v26 = vpop.eup %948 }
  0x98   :  { %v951_v27 = vpop.eup %950  ;;  %v189_v28 = vadd.f32 1.0, %v949_v26 }
  0x99   :  { %v190_v29 = vadd.f32 1.0, %v951_v27  ;;  %v922_v27 = vld [vmem:[%s1222_s8 + $0x3] ss:$4 sm:$0x3] }
  0x9a   :  { %952 = vrcp.f32 %v189_v28  ;;  %v202_v35 = vand.u32 2147483648, %v189_v28  ;;  %v200_v38 = vand.u32 2147483647, %v189_v28  ;;  %vm196_vm3 = vweird.f32 %v189_v28 }
  0x9b   :  { %954 = vrcp.f32 %v190_v29  ;;  %v217_v39 = vand.u32 2147483648, %v190_v29  ;;  %v215_v41 = vand.u32 2147483647, %v190_v29  ;;  %vm211_vm6 = vweird.f32 %v190_v29 }
  0x9c   :  { %v203_v43 = vor.u32 1.1754944e-38, %v202_v35  ;;  %vm201_vm7 = vcmp.eq.f32.partialorder %v200_v38, 8.507059e+37  ;;  %v880_v35 = vld [vmem:[%s1224_s7] sm:$0xff] }
  0x9d   :  { %v218_v46 = vor.u32 1.1754944e-38, %v217_v39  ;;  %vm216_vm9 = vcmp.eq.f32.partialorder %v215_v41, 8.507059e+37 }
  0xa0   :  { %v953_v30 = vpop.eup %952 }
  0xa1   :  { %v955_v31 = vpop.eup %954  ;;  %v192_v32 = vmul.f32 %v953_v30, %v189_v28  ;;  %vm197_vm1 = vweird.f32 %v953_v30 }
  0xa2   :  { %v207_v33 = vmul.f32 %v955_v31, %v190_v29  ;;  %vm212_vm2 = vweird.f32 %v955_v31  ;;  %vm198_vm4 = vmor %vm196_vm3, %vm197_vm1  ;;  %v921_v29 = vld [vmem:[%s1222_s8 + $0x2] ss:$4 sm:$0x3] }
  0xa3   :  { %v193_v34 = vsub.f32 1.0, %v192_v32  ;;  %vm213_vm8 = vmor %vm211_vm6, %vm212_vm2  ;;  %v413_v32 = vperm.slane %v921_v29, 0 }
  0xa4   :  { %v208_v36 = vsub.f32 1.0, %v207_v33  ;;  %v414_v33 = vperm.slane %v921_v29, 1 }
  0xa5   :  { %v194_v37 = vmul.f32 %v953_v30, %v193_v34 }
  0xa6   :  { %v209_v40 = vmul.f32 %v955_v31, %v208_v36 }
  0xa7   :  { %v195_v42 = vadd.f32 %v953_v30, %v194_v37 }
  0xa8   :  { %v210_v44 = vadd.f32 %v955_v31, %v209_v40 }
  0xa9   :  { %v199_v45 = vsel %vm198_vm4, %v953_v30, %v195_v42  ;;  %v1128_v30 = vperm.slane %v922_v27, 0 }
  0xaa   :  { %v204_v47 = vsel %vm201_vm7, %v203_v43, %v199_v45  ;;  %v214_v48 = vsel %vm213_vm8, %v955_v31, %v210_v44  ;;  %v1130_v31 = vperm.slane %v922_v27, 1  ;;  %v380_v45 = vld [vmem:[%s1223_s6] sm:$0xff] }
  0xab   :  { %906 = vmatpush.msk.msrb.mxu2 %vm226_vm5, %v204_v47  ;;  %v219_v50 = vsel %vm216_vm9, %v218_v46, %v214_v48  ;;  %911 = vmatpush.msk.msra.mxu0 %vm226_vm5, %v204_v47  ;;  %v382_v46 = vld [vmem:[%s1223_s6 + $0x10] sm:$0xff] }
  0xac   :  { %908 = vmatpush.msk.msrb.mxu3 %vm226_vm5, %v219_v50  ;;  %913 = vmatpush.msk.msra.mxu1 %vm226_vm5, %v219_v50 }
  0xad   :  { %907 = vmatmul.msk.f32.vlgmr.msrb.gmra.mxu2 %vm222_vm10, %v221_v49  ;;  %909 = vmatmul.msk.f32.vlgmr.msrb.gmra.mxu3 %vm222_vm10, %v221_v49 }
  0xae   :  { %916 = vmatpush.msk.msra.mxu2 %vm226_vm5, %v204_v47  ;;  %918 = vmatpush.msk.msra.mxu3 %vm226_vm5, %v219_v50 }
  0xaf   :  { %912 = vmatmul.msk.f32.vlgmr.msra.gmra.mxu0 %vm222_vm10, %v910_v51  ;;  %914 = vmatmul.msk.f32.vlgmr.msra.gmra.mxu1 %vm222_vm10, %v910_v51 }
  0xb5   :  { %917 = vmatmul.msk.f32.vlgmr.msra.gmra.mxu2 %vm222_vm10, %v915_v52  ;;  %919 = vmatmul.msk.f32.vlgmr.msra.gmra.mxu3 %vm222_vm10, %v915_v52 }
 0x12c   :  { %v297_v55 = vpop.f32.mrf.mxu0  ;;  %v317_v56 = vpop.f32.mrf.mxu1 }
 0x12d   :  { %v320_v59 = vmul.f32 %v297_v55, %v1014_v0  ;;  %v321_v60 = vmul.f32 %v317_v56, %v1019_v1  ;;  %v393_v0 = vlaneseq  ;;  %v384_v55 = vld [vmem:[%s1223_s6 + $0x20] sm:$0xff] }
 0x12f   :  { %v1094_v1 = vand.u32 127, %v393_v0 }
 0x130   :  { %v250_v53 = vpop.f32.mrf.mxu2  ;;  %v270_v54 = vpop.f32.mrf.mxu3 }
 0x131   :  { %v273_v57 = vmul.f32 %v250_v53, %v1024_v2  ;;  %v274_v58 = vmul.f32 %v270_v54, %v1031_v4  ;;  %v373_v2 = vld [vmem:[%s1222_s8] ss:$4 sm:$0x3]  ;;  %vm395_vm11 = vcmp.lt.s32.totalorder %v1094_v1, 16  ;;  %vm719_vm12 = vcmp.lt.s32.totalorder %v1094_v1, 112  ;;  %v383_v54 = vld [vmem:[%s1223_s6 + $0x18] sm:$0xff] }
 0x132   :  { %v399_v4 = vperm.slane %v373_v2, 0  ;;  %vm509_vm13 = vcmp.lt.s32.totalorder %v1094_v1, 127  ;;  %vm409_vm14 = vcmp.lt.s32.totalorder %v1094_v1, 1 }
 0x133   :  { %v322_v63 = vadd.f32 %v320_v59, %v273_v57  ;;  %v323_v3 = vadd.f32 %v321_v60, %v274_v58 }
 0x138   :  { %v346_v61 = vpop.f32.mrf.mxu2  ;;  %v366_v62 = vpop.f32.mrf.mxu3 }
 0x139   :  { %v369_v5 = vmul.f32 %v346_v61, %v1044_v7  ;;  %v370_v6 = vmul.f32 %v366_v62, %v1049_v8  ;;  %v400_v7 = vperm.slane %v373_v2, 1 }
 0x13b   :  { %v1086_v9 = vadd.f32 %v369_v5, %v322_v63  ;;  %v1088_v10 = vadd.f32 %v370_v6, %v323_v3 }
 0x13d   :  { %717 = vrot.lane.b32.xlu2 %v1088_v10, %s957_s5  ;;  %391 = vrot.lane.b32.xlu1 %v1088_v10, %s958_s30 }
 0x13e   :  { %389 = vrot.lane.b32.xlu0 %v1086_v9, %s958_s30 }
 0x145   :  { %715 = vrot.lane.b32.xlu1 %v1086_v9, %s957_s5 }
 0x197   :  { %v718_v18 = vpop.permute.xlu2 %717 }
 0x1af   :  { %v392_v8 = vpop.permute.xlu1 %391 }
 0x1b0   :  { %v390_v11 = vpop.permute.xlu0 %389 }
 0x1b1   :  { %v396_v12 = vsel %vm395_vm11, %v390_v11, %v392_v8  ;;  %v397_v13 = vsel %vm395_vm11, %v392_v8, %v390_v11 }
 0x1b2   :  { %v403_v14 = vmul.f32 %v399_v4, %v397_v13  ;;  %v404_v15 = vmul.f32 %v400_v7, %v396_v12  ;;  %v387_v12 = vld [vmem:[%s1223_s6 + $0x38] sm:$0xff]  ;;  %v388_v13 = vld [vmem:[%s1223_s6 + $0x40] sm:$0xff] }
 0x1b4   :  { %505 = vrot.lane.b32.xlu1 %v403_v14, %s959_s12  ;;  %405 = vrot.lane.b32.xlu2 %v403_v14, %s960_s13 }
 0x1b5   :  { %437 = vmatpush.msrb.mxu0 %v403_v14  ;;  %407 = vrot.lane.b32.xlu0 %v404_v15, %s960_s13 }
 0x1b6   :  { %457 = vmatpush.msrb.mxu1 %v404_v15  ;;  %923 = vmatmul.msk.f32.vlgmr.msrb.gmra.mxu0 %vm41_vm0, %v381_v25 }
 0x1b7   :  { %v716_v17 = vpop.permute.xlu1 %715  ;;  %924 = vmatmul.msk.f32.vlgmr.msrb.gmra.mxu1 %vm41_vm0, %v381_v25 }
 0x1b8   :  { %v720_v20 = vsel %vm719_vm12, %v716_v17, %v718_v18  ;;  %v721_v23 = vsel %vm719_vm12, %v718_v18, %v716_v17 }
 0x1b9   :  { %v1106_v21 = vmul.f32 %v723_v19, %v720_v20  ;;  %v1111_v24 = vmul.f32 %v724_v22, %v721_v23 }
 0x1bc   :  { %566 = vrot.lane.b32.xlu1 %v1088_v10, %s960_s13  ;;  %507 = vrot.lane.b32.xlu2 %v404_v15, %s959_s12 }
 0x1bd   :  { %564 = vrot.lane.b32.xlu0 %v1086_v9, %s960_s13 }
 0x1c4   :  { %729 = vrot.lane.b32.xlu1 %v1106_v21, %s960_s13  ;;  %662 = vrot.lane.b32.xlu2 %v1086_v9, %s959_s12 }
 0x1c5   :  { %664 = vrot.lane.b32.xlu0 %v1088_v10, %s959_s12 }
 0x1cc   :  { %829 = vrot.lane.b32.xlu1 %v1111_v24, %s959_s12  ;;  %731 = vrot.lane.b32.xlu2 %v1111_v24, %s960_s13 }
 0x1cd   :  { %827 = vrot.lane.b32.xlu0 %v1106_v21, %s959_s12 }
 0x1d4   :  { %883 = vperm.xlu2 %947, %v880_v35  }
 0x20e   :  { %v406_v26 = vpop.permute.xlu2 %405 }
 0x216   :  { %v508_v28 = vpop.permute.xlu2 %507 }
 0x21e   :  { %v663_v47 = vpop.permute.xlu2 %662 }
 0x226   :  { %v506_v34 = vpop.permute.xlu1 %505  ;;  %v732_v56 = vpop.permute.xlu2 %731 }
 0x227   :  { %v510_v36 = vsel %vm509_vm13, %v506_v34, %v508_v28  ;;  %v511_v37 = vsel %vm509_vm13, %v508_v28, %v506_v34  ;;  %v408_v38 = vpop.permute.xlu0 %407 }
 0x228   :  { %v517_v39 = vmul.f32 %v1128_v30, %v510_v36  ;;  %v518_v40 = vmul.f32 %v1130_v31, %v511_v37  ;;  %v410_v41 = vsel %vm409_vm14, %v406_v26, %v408_v38  ;;  %v411_v42 = vsel %vm409_vm14, %v408_v38, %v406_v26 }
 0x229   :  { %v417_v43 = vmul.f32 %v413_v32, %v411_v42  ;;  %v418_v44 = vmul.f32 %v414_v33, %v410_v41 }
 0x22a   :  { %537 = vmatpush.msra.mxu0 %v517_v39  ;;  %557 = vmatpush.msra.mxu1 %v518_v40 }
 0x22b   :  { %480 = vmatpush.msrb.mxu2 %v417_v43  ;;  %500 = vmatpush.msrb.mxu3 %v418_v44 }
 0x22c   :  { %925 = vmatmul.msk.f32.vlgmr.msrb.gmra.mxu2 %vm41_vm0, %v380_v45  ;;  %926 = vmatmul.msk.f32.vlgmr.msrb.gmra.mxu3 %vm41_vm0, %v380_v45 }
 0x22d   :  { %635 = vmatpush.msrb.mxu0 %v1086_v9  ;;  %655 = vmatpush.msrb.mxu1 %v1088_v10  ;;  %v385_v9 = vld [vmem:[%s1223_s6 + $0x28] sm:$0xff]  ;;  %v386_v10 = vld [vmem:[%s1223_s6 + $0x30] sm:$0xff] }
 0x22e   :  { %v567_v48 = vpop.permute.xlu1 %566  ;;  %927 = vmatmul.msk.f32.vlgmr.msra.gmra.mxu0 %vm41_vm0, %v382_v46  ;;  %928 = vmatmul.msk.f32.vlgmr.msra.gmra.mxu1 %vm41_vm0, %v382_v46  ;;  %v884_v45 = vpop.permute.xlu2 %883 }
 0x22f   :  { %v565_v49 = vpop.permute.xlu0 %564 }
 0x230   :  { %v568_v50 = vsel %vm409_vm14, %v565_v49, %v567_v48  ;;  %v569_v51 = vsel %vm409_vm14, %v567_v48, %v565_v49 }
 0x231   :  { %v570_v52 = vmul.f32 %v569_v51, %v413_v32  ;;  %v571_v53 = vmul.f32 %v568_v50, %v414_v33 }
 0x233   :  { %590 = vmatpush.msra.mxu2 %v570_v52  ;;  %610 = vmatpush.msra.mxu3 %v571_v53  ;;  %v439_v1 = vpop.f32.mrf.mxu0 }
 0x234   :  { %929 = vmatmul.msk.f32.vlgmr.msra.gmra.mxu2 %vm41_vm0, %v383_v54  ;;  %930 = vmatmul.msk.f32.vlgmr.msra.gmra.mxu3 %vm41_vm0, %v383_v54  ;;  %v459_v14 = vpop.f32.mrf.mxu1 }
 0x236   :  { %v730_v57 = vpop.permute.xlu1 %729  ;;  %931 = vmatmul.msk.f32.vlgmr.msrb.gmra.mxu0 %vm41_vm0, %v384_v55  ;;  %932 = vmatmul.msk.f32.vlgmr.msrb.gmra.mxu1 %vm41_vm0, %v384_v55 }
 0x237   :  { %v733_v58 = vsel %vm409_vm14, %v730_v57, %v732_v56  ;;  %v734_v59 = vsel %vm409_vm14, %v732_v56, %v730_v57  ;;  %v665_v60 = vpop.permute.xlu0 %664 }
 0x238   :  { %v735_v61 = vmul.f32 %v734_v59, %v413_v32  ;;  %v736_v62 = vmul.f32 %v733_v58, %v414_v33  ;;  %v666_v63 = vsel %vm509_vm13, %v663_v47, %v665_v60  ;;  %v667_v3 = vsel %vm509_vm13, %v665_v60, %v663_v47 }
 0x239   :  { %v668_v5 = vmul.f32 %v666_v63, %v1128_v30  ;;  %v669_v6 = vmul.f32 %v667_v3, %v1130_v31 }
 0x23a   :  { %755 = vmatpush.msra.mxu0 %v735_v61  ;;  %775 = vmatpush.msra.mxu1 %v736_v62 }
 0x23b   :  { %688 = vmatpush.msrb.mxu2 %v668_v5  ;;  %708 = vmatpush.msrb.mxu3 %v669_v6 }
 0x23c   :  { %933 = vmatmul.msk.f32.vlgmr.msrb.gmra.mxu2 %vm41_vm0, %v385_v9  ;;  %934 = vmatmul.msk.f32.vlgmr.msrb.gmra.mxu3 %vm41_vm0, %v385_v9 }
 0x23d   :  { %800 = vmatpush.msra.mxu2 %v1106_v21  ;;  %820 = vmatpush.msra.mxu3 %v1111_v24 }
 0x23e   :  { %v830_v0 = vpop.permute.xlu1 %829  ;;  %935 = vmatmul.msk.f32.vlgmr.msra.gmra.mxu0 %vm41_vm0, %v386_v10  ;;  %936 = vmatmul.msk.f32.vlgmr.msra.gmra.mxu1 %vm41_vm0, %v386_v10 }
 0x23f   :  { %v828_v2 = vpop.permute.xlu0 %827 }
 0x240   :  { %v831_v4 = vsel %vm509_vm13, %v828_v2, %v830_v0  ;;  %v832_v7 = vsel %vm509_vm13, %v830_v0, %v828_v2 }
 0x241   :  { %v833_v8 = vmul.f32 %v831_v4, %v1128_v30  ;;  %v834_v11 = vmul.f32 %v832_v7, %v1130_v31 }
 0x243   :  { %853 = vmatpush.msrb.mxu0 %v833_v8  ;;  %873 = vmatpush.msrb.mxu1 %v834_v11 }
 0x244   :  { %937 = vmatmul.msk.f32.vlgmr.msra.gmra.mxu2 %vm41_vm0, %v387_v12  ;;  %938 = vmatmul.msk.f32.vlgmr.msra.gmra.mxu3 %vm41_vm0, %v387_v12 }
 0x246   :  { %939 = vmatmul.msk.f32.vlgmr.msrb.gmra.mxu0 %vm41_vm0, %v388_v13  ;;  %940 = vmatmul.msk.f32.vlgmr.msrb.gmra.mxu1 %vm41_vm0, %v388_v13 }
 0x2ab   :  { %v539_v15 = vpop.f32.mrf.mxu0  ;;  %v559_v16 = vpop.f32.mrf.mxu1 }
 0x2af   :  { %v482_v17 = vpop.f32.mrf.mxu2  ;;  %v502_v18 = vpop.f32.mrf.mxu3 }
 0x2b0   :  { %v483_v21 = vadd.f32 %v482_v17, %v439_v1  ;;  %v503_v22 = vadd.f32 %v502_v18, %v459_v14 }
 0x2b2   :  { %v562_v25 = vadd.f32 %v539_v15, %v483_v21  ;;  %v563_v26 = vadd.f32 %v559_v16, %v503_v22 }
 0x2b3   :  { %v637_v19 = vpop.f32.mrf.mxu0  ;;  %v657_v20 = vpop.f32.mrf.mxu1 }
 0x2b7   :  { %v592_v23 = vpop.f32.mrf.mxu2  ;;  %v612_v24 = vpop.f32.mrf.mxu3 }
 0x2b8   :  { %v615_v27 = vadd.f32 %v592_v23, %v562_v25  ;;  %v616_v28 = vadd.f32 %v612_v24, %v563_v26 }
 0x2ba   :  { %v660_v33 = vadd.f32 %v637_v19, %v615_v27  ;;  %v661_v34 = vadd.f32 %v657_v20, %v616_v28 }
 0x2bb   :  { %v757_v29 = vpop.f32.mrf.mxu0  ;;  %v777_v30 = vpop.f32.mrf.mxu1 }
 0x2bf   :  { %v690_v31 = vpop.f32.mrf.mxu2  ;;  %v710_v32 = vpop.f32.mrf.mxu3 }
 0x2c0   :  { %v713_v35 = vadd.f32 %v690_v31, %v660_v33  ;;  %v714_v36 = vadd.f32 %v710_v32, %v661_v34 }
 0x2c2   :  { %v780_v37 = vadd.f32 %v757_v29, %v713_v35  ;;  %v781_v38 = vadd.f32 %v777_v30, %v714_v36 }
 0x2c3   :  { %v855_v39 = vpop.f32.mrf.mxu0  ;;  %v875_v40 = vpop.f32.mrf.mxu1 }
 0x2c7   :  { %v802_v41 = vpop.f32.mrf.mxu2  ;;  %v822_v42 = vpop.f32.mrf.mxu3 }
 0x2c8   :  { %v825_v43 = vadd.f32 %v802_v41, %v780_v37  ;;  %v826_v44 = vadd.f32 %v822_v42, %v781_v38 }
 0x2ca   :  { %v878_v46 = vadd.f32 %v855_v39, %v825_v43  ;;  %v879_v47 = vadd.f32 %v875_v40, %v826_v44 }
 0x2cc   :  { %v886_v48 = vadd.f32 %v884_v45, %v878_v46  ;;  %v887_v49 = vadd.f32 %v884_v45, %v879_v47 }
 0x2ce   :  { %v888_v50 = vmax.f32 %v886_v48, 0.0  ;;  %v889_v51 = vmax.f32 %v887_v49, 0.0 }
 0x2d0   :  { %890 = vst [vmem:[%s1225_s9] sm:$0xff] %v888_v50 }
 0x2d1   :  { %891 = vst [vmem:[%s1225_s9 + $0x8] sm:$0xff] %v889_v51 }

</bundles_post_ra>
